<compile_context>
chip_gen: v7x
topology: tpu7x:2x2x1
jax: 0.10.0
libtpu: 0.0.40
codegen_flags: <defaults>
</compile_context>

<pallas_src>
import jax
import jax.numpy as jnp
from jax.experimental import pallas as pl
from jax.experimental.pallas import tpu as pltpu

HIDDEN = 500            # total_hidden_size (2 directions x 250)
HALF = HIDDEN // 2      # 250
MID = 100               # per-head hidden width
MID2 = 2 * MID          # fused first-layer width (ner + dis), unpadded
MID2_PAD = 256          # lane-aligned fused first-layer width (zero padded)
NCLS = 2
NOUT = 2 * NCLS         # fused logits: [ner0, ner1, dis0, dis1]
NOUT_PAD = 12           # padded so HIDDEN + NOUT_PAD == SLAB
SLAB = HIDDEN + NOUT_PAD  # 512 — lane-dense fused output slab width


def span_heads_kernel(pairs_ref, w1_ref, b1_ref, w2d_ref, b2d_ref, sign_ref,
                      out_ref):
    # pairs_ref : (2, TB, 500)  plane 0 = x_first rows, plane 1 = x_last rows
    # w1_ref    : (500, 256)    fused + sign-folded + zero-padded first layer
    # b1_ref    : (1, 256)
    # w2d_ref   : (256, 12)     pre-differenced block-diag second layer (padded)
    # b2d_ref   : (1, 12)       pad lanes = -1e9  ->  log-prob pad lanes == 0.0
    # sign_ref  : (1, 500)      +1 for first 250 lanes, -1 for last 250
    # out_ref   : (TB, 512)     [added (500) | log-probs (4) | zero pad (8)]
    xf = pairs_ref[0].astype(jnp.float32)           # (TB, 500)
    xl = pairs_ref[1].astype(jnp.float32)           # (TB, 500)
    diff = xl - xf
    added = diff * sign_ref[...]                    # one vmul (sign row resident)

    # fused first layer for both heads; sign is already folded into w1 so the
    # MXU consumes the raw diff:  diff @ w1_signed == added @ w1
    h = jnp.dot(diff, w1_ref[...], preferred_element_type=jnp.float32) + b1_ref[...]
    h = jnp.maximum(h, 0.0)                         # (TB, 256)

    # fused, pre-differenced second layer: d = other_logit - self_logit
    d = jnp.dot(h, w2d_ref[...], preferred_element_type=jnp.float32) + b2d_ref[...]
    # closed-form 2-class log_softmax:  log p_self = -softplus(other - self)
    logp = -(jnp.maximum(d, 0.0) + jnp.log(1.0 + jnp.exp(-jnp.abs(d))))  # (TB, 12)

    # single lane-dense full-width store (no masked vst, one writeback stream)
    out_ref[...] = jnp.concatenate([added, logp], axis=-1).astype(out_ref.dtype)


def pack_params(params):
    """One-time weight packing (hoisted out of the forward path)."""
    w_lin, b_lin = params["linear"]        # (100, 500), (100,)
    w_ner, b_ner = params["ner_mapping"]   # (2, 100),  (2,)
    w_dis, b_dis = params["dis_linear"]    # (100, 500), (100,)
    w_dm,  b_dm  = params["dis_mapping"]   # (2, 100),  (2,)

    sign = jnp.where(jnp.arange(HIDDEN) < HALF, 1.0, -1.0).astype(jnp.float32)

    # fused first layer, zero-padded to 256 lanes, sign flip folded into rows
    w1 = jnp.zeros((HIDDEN, MID2_PAD), jnp.float32)
    w1 = w1.at[:, :MID].set(w_lin.T)
    w1 = w1.at[:, MID:MID2].set(w_dis.T)
    w1 = w1 * sign[:, None]
    b1 = jnp.zeros((1, MID2_PAD), jnp.float32)
    b1 = b1.at[0, :MID].set(b_lin)
    b1 = b1.at[0, MID:MID2].set(b_dis)

    # block-diagonal second layer, columns = [ner0, ner1, dis0, dis1]
    w2 = jnp.zeros((MID2_PAD, NOUT), jnp.float32)
    w2 = w2.at[:MID, 0:NCLS].set(w_ner.T)
    w2 = w2.at[MID:MID2, NCLS:].set(w_dm.T)
    b2 = jnp.zeros((1, NOUT), jnp.float32)
    b2 = b2.at[0, :NCLS].set(b_ner)
    b2 = b2.at[0, NCLS:].set(b_dm)

    # pre-difference: (other-class column) - (self-class column); pad to 12
    perm = jnp.array([1, 0, 3, 2])
    w2d = jnp.zeros((MID2_PAD, NOUT_PAD), jnp.float32)
    w2d = w2d.at[:, :NOUT].set(w2[:, perm] - w2)
    b2d = jnp.full((1, NOUT_PAD), -1e9, jnp.float32)   # pad lanes -> logp == 0.0
    b2d = b2d.at[0, :NOUT].set((b2[:, perm] - b2)[0])

    return w1, b1, w2d, b2d, sign.reshape(1, HIDDEN)


def _vmem_limit_bytes(tile_b, in_itemsize, out_itemsize):
    # double-buffered activation blocks + (conservatively double-buffered) weights
    act = 2 * (2 * tile_b * HIDDEN * in_itemsize) + 2 * (tile_b * SLAB * out_itemsize)
    wts = 2 * 4 * (HIDDEN * MID2_PAD + MID2_PAD + MID2_PAD * NOUT_PAD + NOUT_PAD + HIDDEN)
    need = act + wts
    # >= 32 MiB lifts v5e's 16 MiB default scoped limit for big tiles; <= 64 MiB
    # keeps the request valid against v7x's 64 MiB physical VMEM per TensorCore.
    return int(min(64 * 2**20, max(32 * 2**20, 2 * need)))


def span_heads(pairs, packed, *, tile_b=None, out_dtype=jnp.float32):
    """pairs: (2, B, 500) stacked [x_first ; x_last] rows (f32 or bf16).
    Returns (added (B,500) f32-ish, logprobs (B,4) = [ner0,ner1,dis0,dis1])."""
    w1, b1, w2d, b2d, sign_row = packed
    two, B, H = pairs.shape
    assert two == 2 and H == HIDDEN

    if tile_b is None:
        # Big tiles amortize the ~0.35us per-grid-step overhead (~30% of HBM
        # roofline at 8 rows vs ~85% at 512), but keep >= 2 grid steps so the
        # "parallel" batch axis can shard across v7x's two TensorCores.
        tile_b = max(8, min(512, B // 2))
    tile_b = min(tile_b, B)
    if tile_b < B and tile_b % 8:
        tile_b = max(8, (tile_b // 8) * 8)      # sublane-dense blocks

    n_blocks = pl.cdiv(B, tile_b)
    Bp = n_blocks * tile_b
    if Bp != B:                                  # tolerate non-multiple batches
        pairs = jnp.pad(pairs, ((0, 0), (0, Bp - B), (0, 0)))

    resident = lambda shape: pl.BlockSpec(shape, lambda b: (0,) * len(shape))

    vmem_limit = _vmem_limit_bytes(tile_b, pairs.dtype.itemsize,
                                   jnp.dtype(out_dtype).itemsize)

    slab = pl.pallas_call(
        span_heads_kernel,
        out_shape=jax.ShapeDtypeStruct((Bp, SLAB), out_dtype),
        grid=(n_blocks,),
        in_specs=[
            pl.BlockSpec((2, tile_b, HIDDEN), lambda b: (0, b, 0)),
            resident((HIDDEN, MID2_PAD)), resident((1, MID2_PAD)),
            resident((MID2_PAD, NOUT_PAD)), resident((1, NOUT_PAD)),
            resident((1, HIDDEN)),
        ],
        out_specs=pl.BlockSpec((tile_b, SLAB), lambda b: (b, 0)),
        compiler_params=pltpu.CompilerParams(
            dimension_semantics=("parallel",),
            vmem_limit_bytes=vmem_limit),
    )(pairs, w1, b1, w2d, b2d, sign_row)

    added = slab[:B, :HIDDEN]
    logprobs = slab[:B, HIDDEN:HIDDEN + NOUT]
    return added, logprobs


def submodel_forward(x, params):
    """x: (seq_len, 500) LSTM output.  Single (first=0, last=-1) span pair.
    Per the perf review, B=1 through pallas_call is pure launch/pipeline
    overhead, so this path is plain XLA; batch span pairs and call
    span_heads() for throughput."""
    f_i, b_i = x[0, :HALF], x[0, HALF:]
    f_j, b_j = x[-1, :HALF], x[-1, HALF:]
    added = jnp.concatenate([f_j - f_i, b_i - b_j]).reshape(1, HIDDEN)

    def head(w, b, w2, b2):
        h = jnp.maximum(added @ w.T + b, 0.0)
        return jax.nn.log_softmax(h @ w2.T + b2, axis=-1)

    ner = head(*params["linear"], *params["ner_mapping"])
    dis = head(*params["dis_linear"], *params["dis_mapping"])
    return added, ner, dis


def init_params(key):
    """Deterministic PyTorch-Linear-style uniform init (unpacked layout)."""
    def linear(k, out_f, in_f):
        k1, k2 = jax.random.split(k)
        bound = 1.0 / jnp.sqrt(in_f)
        w = jax.random.uniform(k1, (out_f, in_f), jnp.float32, -bound, bound)
        b = jax.random.uniform(k2, (out_f,), jnp.float32, -bound, bound)
        return w, b

    k1, k2, k3, k4 = jax.random.split(key, 4)
    return {
        "linear": linear(k1, MID, HIDDEN),
        "ner_mapping": linear(k2, NCLS, MID),
        "dis_linear": linear(k3, MID, HIDDEN),
        "dis_mapping": linear(k4, NCLS, MID),
    }


def _reference_batched(xf, xl, params):
    sign = jnp.where(jnp.arange(HIDDEN) < HALF, 1.0, -1.0)
    added = (xl - xf) * sign

    def head(w, b, w2, b2):
        h = jnp.maximum(added @ w.T + b, 0.0)
        return jax.nn.log_softmax(h @ w2.T + b2, axis=-1)

    ner = head(*params["linear"], *params["ner_mapping"])
    dis = head(*params["dis_linear"], *params["dis_mapping"])
    return added, ner, dis


if __name__ == "__main__":
    key = jax.random.PRNGKey(0)
    kx, kp, kb = jax.random.split(key, 3)

    seq_len = 8
    x = jax.random.normal(kx, (seq_len, HIDDEN), dtype=jnp.float32)
    params = init_params(kp)
    packed = pack_params(params)          # weight packing done once, off hot path

    # --- single span pair (module forward semantics), plain XLA path ---
    added1, ner1, dis1 = jax.block_until_ready(submodel_forward(x, params))
    assert added1.shape == (1, HIDDEN) and ner1.shape == (1, NCLS) and dis1.shape == (1, NCLS)

    # --- batched span pairs through the Pallas kernel ---
    B = 50                                # deliberately NOT a multiple of the tile
    rest = jax.random.normal(kb, (2, B - 1, HIDDEN), dtype=jnp.float32)
    pair0 = jnp.stack([x[0], x[-1]])[:, None, :]       # the module's (0, -1) span
    pairs = jnp.concatenate([pair0, rest], axis=1)     # (2, B, 500) stacked pairs

    added_b, logp_b = span_heads(pairs, packed)
    jax.block_until_ready((added_b, logp_b))

    r_added, r_ner, r_dis = _reference_batched(pairs[0], pairs[1], params)
    assert added_b.shape == (B, HIDDEN) and logp_b.shape == (B, NOUT)
    assert jnp.allclose(added_b, r_added, atol=1e-5)
    assert jnp.allclose(logp_b[:, :NCLS], r_ner, atol=2e-4)
    assert jnp.allclose(logp_b[:, NCLS:], r_dis, atol=2e-4)
    # row 0 reproduces the single-span module forward
    assert jnp.allclose(added_b[0:1], added1, atol=1e-5)
    assert jnp.allclose(logp_b[0:1, :NCLS], ner1, atol=2e-4)
    assert jnp.allclose(logp_b[0:1, NCLS:], dis1, atol=2e-4)

    # --- bf16-at-HBM streaming variant (halves input HBM bytes; f32 in-kernel) ---
    added_h, logp_h = span_heads(pairs.astype(jnp.bfloat16), packed)
    jax.block_until_ready((added_h, logp_h))
    assert jnp.allclose(added_h, r_added, atol=1e-1)
    assert jnp.allclose(logp_h[:, :NCLS], r_ner, atol=1e-1)
    assert jnp.allclose(logp_h[:, NCLS:], r_dis, atol=1e-1)

    print("KERNEL_OK")
</pallas_src>

<mosaic_0001>
module attributes {stable_mosaic.version = 11 : i64} {
  func.func @span_heads_kernel(%arg0: i32, %arg1: memref<2x24x500xf32, #tpu.memory_space<vmem>>, %arg2: memref<500x256xf32, #tpu.memory_space<vmem>>, %arg3: memref<1x256xf32, #tpu.memory_space<vmem>>, %arg4: memref<256x12xf32, #tpu.memory_space<vmem>>, %arg5: memref<1x12xf32, #tpu.memory_space<vmem>>, %arg6: memref<1x500xf32, #tpu.memory_space<vmem>>, %arg7: memref<24x512xf32, #tpu.memory_space<vmem>>) attributes {dimension_semantics = [#tpu.dimension_semantics<parallel>], iteration_bounds = array<i64: 3>, scalar_prefetch = 0 : i64, scratch_operands = 0 : i64, tpu.core_type = #tpu.core_type<tc>, window_params = [{transform_indices = @transform_0, window_bounds = array<i64: 2, 24, 500>}, {pipeline_mode = #tpu.pipeline_mode<synchronous>, transform_indices = @transform_1, window_bounds = array<i64: 500, 256>}, {pipeline_mode = #tpu.pipeline_mode<synchronous>, transform_indices = @transform_2, window_bounds = array<i64: 1, 256>}, {pipeline_mode = #tpu.pipeline_mode<synchronous>, transform_indices = @transform_3, window_bounds = array<i64: 256, 12>}, {pipeline_mode = #tpu.pipeline_mode<synchronous>, transform_indices = @transform_4, window_bounds = array<i64: 1, 12>}, {pipeline_mode = #tpu.pipeline_mode<synchronous>, transform_indices = @transform_5, window_bounds = array<i64: 1, 500>}, {transform_indices = @transform_6, window_bounds = array<i64: 24, 512>}]} {
    %c0 = arith.constant 0 : index
    %c0_0 = arith.constant 0 : index
    %c0_1 = arith.constant 0 : index
    %0 = vector.load %arg1[%c0, %c0_0, %c0_1] : memref<2x24x500xf32, #tpu.memory_space<vmem>>, vector<1x24x500xf32>
    %1 = vector.shape_cast %0 : vector<1x24x500xf32> to vector<24x500xf32>
    %c1 = arith.constant 1 : index
    %c0_2 = arith.constant 0 : index
    %c0_3 = arith.constant 0 : index
    %2 = vector.load %arg1[%c1, %c0_2, %c0_3] : memref<2x24x500xf32, #tpu.memory_space<vmem>>, vector<1x24x500xf32>
    %3 = vector.shape_cast %2 : vector<1x24x500xf32> to vector<24x500xf32>
    %4 = arith.subf %3, %1 : vector<24x500xf32>
    %c0_4 = arith.constant 0 : index
    %c0_5 = arith.constant 0 : index
    %5 = vector.load %arg6[%c0_4, %c0_5] : memref<1x500xf32, #tpu.memory_space<vmem>>, vector<1x500xf32>
    %6 = vector.broadcast %5 : vector<1x500xf32> to vector<24x500xf32>
    %7 = arith.mulf %4, %6 : vector<24x500xf32>
    %c0_6 = arith.constant 0 : index
    %c0_7 = arith.constant 0 : index
    %8 = vector.load %arg2[%c0_6, %c0_7] : memref<500x256xf32, #tpu.memory_space<vmem>>, vector<500x256xf32>
    %cst = arith.constant dense<0.000000e+00> : vector<24x256xf32>
    %9 = tpu.matmul %4, %8, %cst {dimension_numbers = #tpu.dot_dimension_numbers<[1], [0], [0], [1], [0, 0, 1, 1], [], []>} : vector<24x500xf32>, vector<500x256xf32>, vector<24x256xf32> -> vector<24x256xf32>
    %c0_8 = arith.constant 0 : index
    %c0_9 = arith.constant 0 : index
    %10 = vector.load %arg3[%c0_8, %c0_9] : memref<1x256xf32, #tpu.memory_space<vmem>>, vector<1x256xf32>
    %11 = vector.broadcast %10 : vector<1x256xf32> to vector<24x256xf32>
    %12 = arith.addf %9, %11 : vector<24x256xf32>
    %cst_10 = arith.constant 0.000000e+00 : f32
    %13 = vector.broadcast %cst_10 : f32 to vector<24x256xf32>
    %14 = arith.maximumf %12, %13 : vector<24x256xf32>
    %c0_11 = arith.constant 0 : index
    %c0_12 = arith.constant 0 : index
    %15 = vector.load %arg4[%c0_11, %c0_12] : memref<256x12xf32, #tpu.memory_space<vmem>>, vector<256x12xf32>
    %cst_13 = arith.constant dense<0.000000e+00> : vector<24x12xf32>
    %16 = tpu.matmul %14, %15, %cst_13 {dimension_numbers = #tpu.dot_dimension_numbers<[1], [0], [0], [1], [0, 0, 1, 1], [], []>} : vector<24x256xf32>, vector<256x12xf32>, vector<24x12xf32> -> vector<24x12xf32>
    %c0_14 = arith.constant 0 : index
    %c0_15 = arith.constant 0 : index
    %17 = vector.load %arg5[%c0_14, %c0_15] : memref<1x12xf32, #tpu.memory_space<vmem>>, vector<1x12xf32>
    %18 = vector.broadcast %17 : vector<1x12xf32> to vector<24x12xf32>
    %19 = arith.addf %16, %18 : vector<24x12xf32>
    %cst_16 = arith.constant 0.000000e+00 : f32
    %20 = vector.broadcast %cst_16 : f32 to vector<24x12xf32>
    %21 = arith.maximumf %19, %20 : vector<24x12xf32>
    %22 = math.absf %19 : vector<24x12xf32>
    %cst_17 = arith.constant 0.000000e+00 : f32
    %23 = vector.broadcast %cst_17 : f32 to vector<24x12xf32>
    %24 = arith.subf %23, %22 : vector<24x12xf32>
    %25 = math.exp %24 : vector<24x12xf32>
    %cst_18 = arith.constant 1.000000e+00 : f32
    %26 = vector.broadcast %cst_18 : f32 to vector<24x12xf32>
    %27 = arith.addf %26, %25 : vector<24x12xf32>
    %28 = math.log %27 : vector<24x12xf32>
    %29 = arith.addf %21, %28 : vector<24x12xf32>
    %cst_19 = arith.constant 0.000000e+00 : f32
    %30 = vector.broadcast %cst_19 : f32 to vector<24x12xf32>
    %31 = arith.subf %30, %29 : vector<24x12xf32>
    %32 = tpu.concatenate %7, %31 in 1 : vector<24x500xf32>, vector<24x12xf32> -> vector<24x512xf32>
    %c0_20 = arith.constant 0 : index
    %c0_21 = arith.constant 0 : index
    %33 = vector.load %arg7[%c0_20, %c0_21] : memref<24x512xf32, #tpu.memory_space<vmem>>, vector<24x512xf32>
    tpu.vector_store %arg7[%c0_20, %c0_21], %32 {strides = array<i32>} : memref<24x512xf32, #tpu.memory_space<vmem>>, vector<24x512xf32>,
    return
  }
  func.func @transform_0(%arg0: i32) -> (i32, i32, i32) {
    %c0_i32 = arith.constant 0 : i32
    %c0_i32_0 = arith.constant 0 : i32
    %c0_i32_1 = arith.constant 0 : i32
    return %c0_i32, %arg0, %c0_i32_0 : i32, i32, i32
  }
  func.func @transform_1(%arg0: i32) -> (i32, i32) {
    %c0_i32 = arith.constant 0 : i32
    %c0_i32_0 = arith.constant 0 : i32
    %c0_i32_1 = arith.constant 0 : i32
    return %c0_i32, %c0_i32_0 : i32, i32
  }
  func.func @transform_2(%arg0: i32) -> (i32, i32) {
    %c0_i32 = arith.constant 0 : i32
    %c0_i32_0 = arith.constant 0 : i32
    %c0_i32_1 = arith.constant 0 : i32
    return %c0_i32, %c0_i32_0 : i32, i32
  }
  func.func @transform_3(%arg0: i32) -> (i32, i32) {
    %c0_i32 = arith.constant 0 : i32
    %c0_i32_0 = arith.constant 0 : i32
    %c0_i32_1 = arith.constant 0 : i32
    return %c0_i32, %c0_i32_0 : i32, i32
  }
  func.func @transform_4(%arg0: i32) -> (i32, i32) {
    %c0_i32 = arith.constant 0 : i32
    %c0_i32_0 = arith.constant 0 : i32
    %c0_i32_1 = arith.constant 0 : i32
    return %c0_i32, %c0_i32_0 : i32, i32
  }
  func.func @transform_5(%arg0: i32) -> (i32, i32) {
    %c0_i32 = arith.constant 0 : i32
    %c0_i32_0 = arith.constant 0 : i32
    %c0_i32_1 = arith.constant 0 : i32
    return %c0_i32, %c0_i32_0 : i32, i32
  }
  func.func @transform_6(%arg0: i32) -> (i32, i32) {
    %c0_i32 = arith.constant 0 : i32
    %c0_i32_0 = arith.constant 0 : i32
    return %arg0, %c0_i32 : i32, i32
  }
}

</mosaic_0001>

<bundles_post_ra>
// kernel: tpu_custom_call.1
= control target key start
LH: loop header
LB: loop body
LE: loop exit
PB: predicated region body
PF: predicated region fallthrough
CT: control target
= control target key end

     0   :  { %s1937_s0 = inlined_call_operand.hbm [shape: f32[2,72,500], index: 0, kind: input, shape index: {}]   ;;  %s1938_s1 = inlined_call_operand.hbm [shape: f32[500,256], index: 1, kind: input, shape index: {}]   ;;  %s1939_s2 = inlined_call_operand.vmem [shape: f32[1,256], index: 2, kind: input, shape index: {}]   ;;  %s1940_s3 = inlined_call_operand.vmem [shape: f32[256,12], index: 3, kind: input, shape index: {}]   ;;  %s1941_s4 = inlined_call_operand.vmem [shape: f32[1,12], index: 4, kind: input, shape index: {}]   ;;  %s1942_s5 = inlined_call_operand.vmem [shape: f32[1,500], index: 5, kind: input, shape index: {}]   ;;  %s1943_s6 = inlined_call_operand.hbm [shape: f32[72,512], index: 6, kind: output, shape index: {}]  }
   0x1   :  { %1949 = sst [smem:[#allocation15_spill]] %s1938_s1 }
   0x2   :  { %11 = vsyncpa [#allocation3], 0 }
   0x3   :  { %13 = vsyncpa [#allocation3 + $0x1], 0 }
   0x4   :  { %14 = vsyncpa [#allocation6], 0 }
   0x5   :  { %15 = vsyncpa [#allocation4], 0 }
   0x6   :  { %17 = vsyncpa [#allocation4 + $0x1], 0  ;;  %s1481_s21 = smov 0   ;;  %s1483_s22 = smov 0  }
   0x7   :  { %s1485_s23 = smov 0   ;;  %s1487_s24 = smov 0  }
   0x8 LB: > { %s1502_s25 = sadd.s32 4294967295, %s1431_s24   ;;  %s985_s26 = sadd.s32 4294967294, %s1431_s24   ;;  %s1431_s24 = sphi %s1487_s24, %s1969_s24   ;;  %s1427_s23 = sphi %s1485_s23, %s1968_s23   ;;  %s1423_s22 = sphi %s1483_s22, %s1967_s22   ;;  %s1419_s21 = sphi %s1481_s21, %s1966_s21  }
   0x9   : > { %s1506_s27 = sadd.s32 1, %s1431_s24   ;;  %s30_s28 = sadd.s32 1, %s1427_s23 }
   0xa   : > { %s27_s29 = ssub.s32 %s1431_s24, %s1506_s27  ;;  %p37_p0 = scmp.ne.s32.totalorder %s1427_s23, %s1423_s22 }
   0xb   : > { %p28_p1 = scmp.eq.s32.totalorder %s27_s29, 0  ;;  %p38_p2 = scmp.eq.s32.totalorder %s1431_s24, 0 }
   0xc   : > { %p43_p3 = scmp.ne.s32.totalorder %s1423_s22, %s1419_s21  ;;  %p1944_p4 = scmp.eq.s32.totalorder %s1502_s25, 0 }
   0xd   : > { %s1518_s30 = scalar_select %p28_p1, %s1427_s23, %s30_s28  }
   0xe   : > { %p1520_p5 = por %p38_p2, %p37_p0  ;;  %p1526_p6 = por %p1944_p4, %p43_p3 }
   0xf   : > { %1950 = sst [smem:[#allocation14_spill]] %s1518_s30  ;;  %p172_p7 = scmp.eq.s32.totalorder %s1502_s25, 2 }
  0x10   : > { %s1951_s7 = scalar_select %p1520_p5, 1, 0 }
  0x11   : > { %s1952_s8 = scalar_select %p1526_p6, 1, 0 }
  0x12   : > { %p178_p8 = scmp.eq.s32.totalorder %s985_s26, 2  ;;  %p986_p9 = scmp.ge.s32.totalorder %s1431_s24, 1 }
  0x13   : > { %p185_p10 = scmp.lt.s32.totalorder %s1431_s24, 4  ;;  %p1533_p11 = por %p172_p7, %p37_p0 }
  0x14   : > { %p1537_p12 = por %p178_p8, %p43_p3  ;;  %s1433_s12 = smov [#allocation5]  }
  0x15   : > { %s1953_s9 = scalar_select %p1533_p11, 1, 0 }
  0x16   : > { %s1954_s10 = scalar_select %p1537_p12, 1, 0 }
  0x17   : > { %p1541_p13 = pnand %p986_p9, %p185_p10  ;;  %s197_s13 = sshll.u32 %s1433_s12, 4  ;;  %s198_s13 = int_to_ptr.vmem [resolvable:$true] %s197_s13 }
  0x18   : > { %s1957_s1 = sld [smem:[#allocation15_spill]] }
  0x19   : > { %s1955_s11 = scalar_select %p1541_p13, 1, 0 }
  0x1a   : > { %p1266_p1 = pneg %p1541_p13 }
  0x1c   : > { %p1549_p2 = pnand %p1266_p1, %p1944_p4 }
  0x1e   : > { %s1333_s17 = scalar_lea.hbm %s1957_s1, 16128  ;;  %p1335_p3 = pneg %p1549_p2 }
  0x1f   : > { %p1334_p0 = scmp.ne.s32.totalorder %s1957_s1, %s1333_s17  ;;  %p1340_p9 = scmp.lt.u32.totalorder %s1333_s17, %s1957_s1 }
  0x21   : > { %p1336_p7 = pnand %p1335_p3, %p1334_p0 }
  0x23   : > { %p1337_p8 = pneg %p1336_p7 }
  0x25   : > { %p1342_p10 = pnand %p1340_p9, %p1337_p8 }
  0x27   : > { %1345 = shalt.err (!%p1342_p10)
}
  0x28   : > { %s1346_s28 = scalar_lea.vmem %s198_s13, 16128  ;;  %p1354_p11 = scmp.lt.s32.totalorder %s198_s13, %s198_s13 }
  0x29   : > { %p1347_p1 = scmp.ne.s32.totalorder %s198_s13, %s1346_s28  ;;  %p1355_p6 = scmp.lt.s32.totalorder %s1346_s28, %s1346_s28 }
  0x2b   : > { %p1349_p4 = pnand %p1347_p1, %p1335_p3  ;;  %p1356_p13 = por %p1355_p6, %p1354_p11 }
  0x2d   : > { %p1350_p12 = pneg %p1349_p4 }
  0x2f   : > { %p1357_p5 = pnand %p1356_p13, %p1350_p12 }
  0x31   : > { %1360 = shalt.err (!%p1357_p5)
}
  0x32   : > { %s1434_s29 = smov 256   ;;  %s1435_s12 = smov 16  }
  0x33   : > { %1269 = dma.hbm_to_vmem [thread:$0]  (!%p1549_p2), %s1957_s1, 16128, %s198_s13, [#allocation6], %s1434_s29, %s1434_s29, %s1435_s12  }
  0x34   : > { %p988_p0 = scmp.ge.s32.totalorder %s1431_s24, 3 }
  0x36   : > { %219 = sbr.rel (%p988_p0) target bundleno = 77 (0x4d), region = 36 }
  0x3d   : > { %s223_s17 = sand.u32 1, %s1427_s23   ;;  %s1021_s18 = smul.u32 1536, %s1431_s24 }
  0x3e   : > { %s1248_s19 = smul.u32 192, %s223_s17  ;;  %s1436_s20 = smov 4608  }
  0x3f   : > { %p1958_p4 = scmp.ne.s32.totalorder %s1951_s7, 0  ;;  %s234_s28 = scalar_lea.hbm %s1937_s0, %s1021_s18 }
  0x40   : > { %s227_s12 = scalar_lea.vmem [#allocation2], %s1248_s19  ;;  %s1437_s16 = smov 1536  }
  0x41   : > { %1254 = sst [smem:[#allocation9]] (%p1958_p4), %s1436_s20  ;;  %s247_s15 = sshll.u32 %s227_s12, 4  ;;  %s248_s15 = int_to_ptr.vmem [resolvable:$true] %s247_s15 }
  0x42   : > { %s1253_s13 = scalar_select %p1958_p4, [#allocation0], [#allocation10] }
  0x43   : > { %1255 = sst [smem:[#allocation9 + $0x1]] (%p1958_p4), %s1437_s16  ;;  %s1438_s1 = smov 3  }
  0x44   : > { %s239_s29 = sld [smem:[%s1253_s13]]   ;;  %s1439_s30 = smov 512  }
  0x45   : > { %1256 = sst [smem:[#allocation9 + $0x2]] (%p1958_p4), %s1438_s1  ;;  %s1440_s20 = smov 32  }
  0x46   : > { %1257 = sst [smem:[#allocation9 + $0x3]] (%p1958_p4), %s1439_s30  ;;  %s224_s19 = scalar_lea.sflag [#allocation3], %s223_s17 }
  0x47   : > { %1258 = sst [smem:[#allocation9 + $0x4]] (%p1958_p4), %s1439_s30  ;;  %s1441_s14 = smov [#allocation8]  }
  0x48   : > { %1259 = sst [smem:[#allocation9 + $0x5]] (%p1958_p4), %s1440_s20 }
  0x4a   : > { %s991_s18 = sshll.u32 %s239_s29, 26 }
  0x4b   : > { %s992_s13 = sadd.s32 134217728, %s991_s18 }
  0x4c   : > { %1260 = dma.general (%p1958_p4), %s234_s28, 3072, %s248_s15, %s224_s19, %s1441_s14, [#allocation9], %s992_s13, 0  }
  0x4d PF: > { %p1959_p5 = scmp.ne.s32.totalorder %s1955_s11, 0 }
  0x4e   : > { %s1594_s1 = sand.u32 (!%p1959_p5), 1, %s1423_s22   ;;  %p1960_p6 = scmp.ne.s32.totalorder (!%p1959_p5), %s1952_s8, 0 }
  0x4f   : > { %272 = sbr.rel (%p1959_p5) target bundleno = 769 (0x301), region = 44  ;;  %s275_s26 = scalar_lea.sflag (!%p1959_p5), [#allocation3], %s1594_s1 }
  0x50   : > { %s1249_s30 = smul.u32 (!%p1959_p5), 192, %s1594_s1 }
  0x52   : > { %s1598_s12 = scalar_lea.vmem (!%p1959_p5), [#allocation2], %s1249_s30 }
  0x56   : > { %1406 = dma.done.wait (%p1960_p6), %s275_s26, 3072  }
  0x57   : > { %1408 = vsyncadd (%p1960_p6), %s275_s26, 4294964224  ;;  %p1961_p11 = scmp.eq.s32.totalorder %s1502_s25, 0 }
  0x59   : > { %1410 = dma.done.wait (%p1961_p11), [#allocation6], 16128   ;;  %p1962_p12 = pmov %p1961_p11 }
  0x5a   : > { %v385_v0 = vld [vmem:[#allocation5 + $0x8] sm:$0xff]  ;;  %v387_v1 = vld [vmem:[#allocation5 + $0x18] sm:$0xff]  ;;  %v384_v2 = vld [vmem:[#allocation5] sm:$0xff]  ;;  %s1250_s7 = smul.u32 96, %s1594_s1  ;;  %vm522_vm0 = vcmask 949248   ;;  %vm532_vm1 = vcmask 1043456  }
  0x5b   : > { %1412 = vsyncadd (%p1962_p12), [#allocation6], 4294951168  ;;  %v1064_v3 = vpack.c.bf16 %v387_v1, %v385_v0  ;;  %v386_v4 = vld [vmem:[#allocation5 + $0x10] sm:$0xff]  ;;  %v449_v5 = vld [vmem:[#allocation5 + $0x208] sm:$0xff]  ;;  %s1442_s14 = smov 116   ;;  %s1022_s30 = smul.u32 1536, %s1502_s25 }
  0x5c   : > { %v451_v6 = vld [vmem:[#allocation5 + $0x218] sm:$0xff]  ;;  %v1066_v7 = vpack.c.bf16 %v386_v4, %v384_v2  ;;  %v389_v9 = vld [vmem:[#allocation5 + $0x28] sm:$0xff]  ;;  %v448_v11 = vld [vmem:[#allocation5 + $0x200] sm:$0xff]  ;;  %s1694_s17 = scalar_lea.vmem [#allocation7], %s1250_s7  ;;  %s888_s25 = scalar_lea.sflag [#allocation4], %s1594_s1 }
  0x5d   : > { %v1128_v8 = vpack.c.bf16 %v451_v6, %v449_v5  ;;  %v391_v10 = vld [vmem:[#allocation5 + $0x38] sm:$0xff]  ;;  %1065 = vmatprep.subr.bf16.mxu0 %v1064_v3  ;;  %v450_v13 = vld [vmem:[#allocation5 + $0x210] sm:$0xff]  ;;  %v388_v14 = vld [vmem:[#allocation5 + $0x20] sm:$0xff]  ;;  %s902_s26 = sshll.u32 %s1694_s17, 4  ;;  %s1890_s11 = scalar_lea.hbm %s1943_s6, %s1022_s30  ;;  %s1892_s26 = int_to_ptr.vmem [resolvable:$true] %s902_s26 }
  0x5e   : > { %v1068_v12 = vpack.c.bf16 %v391_v10, %v389_v9  ;;  %v390_v15 = vld [vmem:[#allocation5 + $0x30] sm:$0xff]  ;;  %1067 = vmatpush1.bf16.msra.mxu0 %v1066_v7  ;;  %v1130_v16 = vpack.c.bf16 %v450_v13, %v448_v11  ;;  %v453_v18 = vld [vmem:[#allocation5 + $0x228] sm:$0xff]  ;;  %v455_v19 = vld [vmem:[#allocation5 + $0x238] sm:$0xff]  ;;  %s1361_s28 = scalar_lea.vmem %s1892_s26, 1536  ;;  %p1963_p2 = scmp.ne.s32.totalorder %s1953_s9, 0 }
  0x5f   : > { %1129 = vmatprep.subr.bf16.mxu1 %v1128_v8  ;;  %v1070_v17 = vpack.c.bf16 %v390_v15, %v388_v14  ;;  %v393_v20 = vld [vmem:[#allocation5 + $0x48] sm:$0xff]  ;;  %v1132_v21 = vpack.c.bf16 %v455_v19, %v453_v18  ;;  %v395_v22 = vld [vmem:[#allocation5 + $0x58] sm:$0xff]  ;;  %v452_v23 = vld [vmem:[#allocation5 + $0x220] sm:$0xff]  ;;  %p1362_p13 = scmp.ne.s32.totalorder %s1892_s26, %s1361_s28  ;;  %s1443_s29 = smov [#allocation7]  }
  0x60   : > { %1069 = vmatprep.subr.bf16.mxu0 %v1068_v12  ;;  %v454_v24 = vld [vmem:[#allocation5 + $0x230] sm:$0xff]  ;;  %1131 = vmatpush1.bf16.msra.mxu1 %v1130_v16  ;;  %v1072_v25 = vpack.c.bf16 %v395_v22, %v393_v20  ;;  %v392_v27 = vld [vmem:[#allocation5 + $0x40] sm:$0xff]  ;;  %v457_v29 = vld [vmem:[#allocation5 + $0x248] sm:$0xff]  ;;  %s1365_s15 = sshll.u32 %s1443_s29, 4  ;;  %s1366_s15 = int_to_ptr.vmem [resolvable:$false] %s1365_s15 }
  0x61   : > { %v1134_v26 = vpack.c.bf16 %v454_v24, %v452_v23  ;;  %v394_v28 = vld [vmem:[#allocation5 + $0x50] sm:$0xff]  ;;  %1133 = vmatprep.subr.bf16.mxu1 %v1132_v21  ;;  %v459_v30 = vld [vmem:[#allocation5 + $0x258] sm:$0xff]  ;;  %v397_v31 = vld [vmem:[#allocation5 + $0x68] sm:$0xff]  ;;  %p1363_p3 = pnand %p1362_p13, %p1963_p2  ;;  %s1367_s16 = scalar_lea.vmem %s1366_s15, 3072 }
  0x62   : > { %v399_v32 = vld [vmem:[#allocation5 + $0x78] sm:$0xff]  ;;  %1071 = vmatpush1.bf16.msra.mxu0 %v1070_v17  ;;  %v1074_v33 = vpack.c.bf16 %v394_v28, %v392_v27  ;;  %v1136_v34 = vpack.c.bf16 %v459_v30, %v457_v29  ;;  %v456_v35 = vld [vmem:[#allocation5 + $0x240] sm:$0xff]  ;;  %v458_v36 = vld [vmem:[#allocation5 + $0x250] sm:$0xff]  ;;  %p1368_p8 = scmp.lt.s32.totalorder %s1892_s26, %s1366_s15  ;;  %p1369_p9 = scmp.lt.s32.totalorder %s1367_s16, %s1361_s28 }
  0x63   : > { %v396_v37 = vld [vmem:[#allocation5 + $0x60] sm:$0xff]  ;;  %1073 = vmatprep.subr.bf16.mxu0 %v1072_v25  ;;  %v1076_v38 = vpack.c.bf16 %v399_v32, %v397_v31  ;;  %v398_v39 = vld [vmem:[#allocation5 + $0x70] sm:$0xff]  ;;  %v461_v40 = vld [vmem:[#allocation5 + $0x268] sm:$0xff]  ;;  %v1138_v42 = vpack.c.bf16 %v458_v36, %v456_v35  ;;  %p1364_p7 = pneg %p1363_p3 }
  0x64   : > { %v463_v41 = vld [vmem:[#allocation5 + $0x278] sm:$0xff]  ;;  %1135 = vmatpush1.bf16.msra.mxu1 %v1134_v26  ;;  %v401_v43 = vld [vmem:[#allocation5 + $0x88] sm:$0xff]  ;;  %v460_v46 = vld [vmem:[#allocation5 + $0x260] sm:$0xff]  ;;  %v1078_v48 = vpack.c.bf16 %v398_v39, %v396_v37  ;;  %p1370_p10 = por %p1369_p9, %p1368_p8 }
  0x65   : > { %v403_v44 = vld [vmem:[#allocation5 + $0x98] sm:$0xff]  ;;  %1137 = vmatprep.subr.bf16.mxu1 %v1136_v34  ;;  %v1140_v45 = vpack.c.bf16 %v463_v41, %v461_v40  ;;  %v462_v47 = vld [vmem:[#allocation5 + $0x270] sm:$0xff]  ;;  %v465_v49 = vld [vmem:[#allocation5 + $0x288] sm:$0xff] }
  0x66   : > { %1075 = vmatpush1.bf16.msra.mxu0 %v1074_v33  ;;  %v467_v50 = vld [vmem:[#allocation5 + $0x298] sm:$0xff]  ;;  %v1080_v51 = vpack.c.bf16 %v403_v44, %v401_v43  ;;  %v400_v52 = vld [vmem:[#allocation5 + $0x80] sm:$0xff]  ;;  %v402_v53 = vld [vmem:[#allocation5 + $0x90] sm:$0xff]  ;;  %v1142_v54 = vpack.c.bf16 %v462_v47, %v460_v46  ;;  %p1371_p1 = pnand %p1370_p10, %p1364_p7 }
  0x67   : > { %1077 = vmatprep.subr.bf16.mxu0 %v1076_v38  ;;  %v405_v55 = vld [vmem:[#allocation5 + $0xa8] sm:$0xff]  ;;  %v407_v56 = vld [vmem:[#allocation5 + $0xb8] sm:$0xff]  ;;  %v1144_v57 = vpack.c.bf16 %v467_v50, %v465_v49  ;;  %v464_v58 = vld [vmem:[#allocation5 + $0x280] sm:$0xff]  ;;  %v1082_v60 = vpack.c.bf16 %v402_v53, %v400_v52  ;;  %v352_v50 = vlaneseq }
  0x68   : > { %1139 = vmatpush1.bf16.msra.mxu1 %v1138_v42  ;;  %v466_v59 = vld [vmem:[#allocation5 + $0x290] sm:$0xff]  ;;  %v469_v61 = vld [vmem:[#allocation5 + $0x2a8] sm:$0xff]  ;;  %v471_v62 = vld [vmem:[#allocation5 + $0x2b8] sm:$0xff]  ;;  %v1084_v63 = vpack.c.bf16 %v407_v56, %v405_v55 }
  0x69   : > { %1141 = vmatprep.subr.bf16.mxu1 %v1140_v45  ;;  %v404_v0 = vld [vmem:[#allocation5 + $0xa0] sm:$0xff]  ;;  %v406_v1 = vld [vmem:[#allocation5 + $0xb0] sm:$0xff]  ;;  %v1146_v2 = vpack.c.bf16 %v466_v59, %v464_v58  ;;  %v409_v3 = vld [vmem:[#allocation5 + $0xc8] sm:$0xff]  ;;  %v1148_v5 = vpack.c.bf16 %v471_v62, %v469_v61 }
  0x6a   : > { %1079 = vmatpush1.bf16.msra.mxu0 %v1078_v48  ;;  %v411_v4 = vld [vmem:[#allocation5 + $0xd8] sm:$0xff]  ;;  %v468_v6 = vld [vmem:[#allocation5 + $0x2a0] sm:$0xff]  ;;  %v470_v7 = vld [vmem:[#allocation5 + $0x2b0] sm:$0xff]  ;;  %v1086_v8 = vpack.c.bf16 %v406_v1, %v404_v0  ;;  %v1608_v0 = vshrl.u32 %v352_v50, 7 }
  0x6b   : > { %1081 = vmatprep.subr.bf16.mxu0 %v1080_v51  ;;  %v473_v9 = vld [vmem:[#allocation5 + $0x2c8] sm:$0xff]  ;;  %v475_v10 = vld [vmem:[#allocation5 + $0x2d8] sm:$0xff]  ;;  %v1088_v11 = vpack.c.bf16 %v411_v4, %v409_v3  ;;  %v408_v12 = vld [vmem:[#allocation5 + $0xc0] sm:$0xff]  ;;  %v1150_v14 = vpack.c.bf16 %v470_v7, %v468_v6 }
  0x6c   : > { %1143 = vmatpush1.bf16.msra.mxu1 %v1142_v54  ;;  %v410_v13 = vld [vmem:[#allocation5 + $0xd0] sm:$0xff]  ;;  %v413_v15 = vld [vmem:[#allocation5 + $0xe8] sm:$0xff]  ;;  %v415_v16 = vld [vmem:[#allocation5 + $0xf8] sm:$0xff]  ;;  %v1152_v17 = vpack.c.bf16 %v475_v10, %v473_v9  ;;  %v366_v9 = vsub.s32 3, %v1608_v0  ;;  %v362_v10 = vsub.s32 2, %v1608_v0 }
  0x6d   : > { %1145 = vmatprep.subr.bf16.mxu1 %v1144_v57  ;;  %v472_v18 = vld [vmem:[#allocation5 + $0x2c0] sm:$0xff]  ;;  %v474_v19 = vld [vmem:[#allocation5 + $0x2d0] sm:$0xff]  ;;  %v1090_v20 = vpack.c.bf16 %v410_v13, %v408_v12  ;;  %v477_v21 = vld [vmem:[#allocation5 + $0x2e8] sm:$0xff]  ;;  %v1092_v23 = vpack.c.bf16 %v415_v16, %v413_v15 }
  0x6e   : > { %1083 = vmatpush1.bf16.msra.mxu0 %v1082_v60  ;;  %v479_v22 = vld [vmem:[#allocation5 + $0x2f8] sm:$0xff]  ;;  %v412_v24 = vld [vmem:[#allocation5 + $0xe0] sm:$0xff]  ;;  %v414_v25 = vld [vmem:[#allocation5 + $0xf0] sm:$0xff]  ;;  %v1154_v26 = vpack.c.bf16 %v474_v19, %v472_v18 }
  0x6f   : > { %1085 = vmatprep.subr.bf16.mxu0 %v1084_v63  ;;  %v417_v27 = vld [vmem:[#allocation5 + $0x108] sm:$0xff]  ;;  %v419_v28 = vld [vmem:[#allocation5 + $0x118] sm:$0xff]  ;;  %v1156_v29 = vpack.c.bf16 %v479_v22, %v477_v21  ;;  %v476_v30 = vld [vmem:[#allocation5 + $0x2e0] sm:$0xff]  ;;  %v1094_v32 = vpack.c.bf16 %v414_v25, %v412_v24  ;;  %v354_v21 = vsub.s32 0, %v1608_v0 }
  0x70   : > { %1147 = vmatpush1.bf16.msra.mxu1 %v1146_v2  ;;  %v478_v31 = vld [vmem:[#allocation5 + $0x2f0] sm:$0xff]  ;;  %v481_v33 = vld [vmem:[#allocation5 + $0x308] sm:$0xff]  ;;  %v483_v34 = vld [vmem:[#allocation5 + $0x318] sm:$0xff]  ;;  %v1096_v35 = vpack.c.bf16 %v419_v28, %v417_v27 }
  0x71   : > { %1149 = vmatprep.subr.bf16.mxu1 %v1148_v5  ;;  %v416_v36 = vld [vmem:[#allocation5 + $0x100] sm:$0xff]  ;;  %v418_v37 = vld [vmem:[#allocation5 + $0x110] sm:$0xff]  ;;  %v1158_v38 = vpack.c.bf16 %v478_v31, %v476_v30  ;;  %v421_v39 = vld [vmem:[#allocation5 + $0x128] sm:$0xff]  ;;  %v1160_v41 = vpack.c.bf16 %v483_v34, %v481_v33 }
  0x72   : > { %1087 = vmatpush1.bf16.msra.mxu0 %v1086_v8  ;;  %v423_v40 = vld [vmem:[#allocation5 + $0x138] sm:$0xff]  ;;  %v480_v42 = vld [vmem:[#allocation5 + $0x300] sm:$0xff]  ;;  %v482_v43 = vld [vmem:[#allocation5 + $0x310] sm:$0xff]  ;;  %v1098_v44 = vpack.c.bf16 %v418_v37, %v416_v36 }
  0x73   : > { %1089 = vmatprep.subr.bf16.mxu0 %v1088_v11  ;;  %v485_v45 = vld [vmem:[#allocation5 + $0x328] sm:$0xff]  ;;  %v487_v46 = vld [vmem:[#allocation5 + $0x338] sm:$0xff]  ;;  %v1100_v47 = vpack.c.bf16 %v423_v40, %v421_v39  ;;  %v420_v48 = vld [vmem:[#allocation5 + $0x120] sm:$0xff]  ;;  %v1162_v51 = vpack.c.bf16 %v482_v43, %v480_v42 }
  0x74   : > { %1151 = vmatpush1.bf16.msra.mxu1 %v1150_v14  ;;  %v422_v49 = vld [vmem:[#allocation5 + $0x130] sm:$0xff]  ;;  %v425_v52 = vld [vmem:[#allocation5 + $0x148] sm:$0xff]  ;;  %v427_v53 = vld [vmem:[#allocation5 + $0x158] sm:$0xff]  ;;  %v1164_v54 = vpack.c.bf16 %v487_v46, %v485_v45 }
  0x75   : > { %1153 = vmatprep.subr.bf16.mxu1 %v1152_v17  ;;  %v484_v55 = vld [vmem:[#allocation5 + $0x320] sm:$0xff]  ;;  %v486_v56 = vld [vmem:[#allocation5 + $0x330] sm:$0xff]  ;;  %v1102_v57 = vpack.c.bf16 %v422_v49, %v420_v48  ;;  %v489_v58 = vld [vmem:[#allocation5 + $0x348] sm:$0xff]  ;;  %v1104_v60 = vpack.c.bf16 %v427_v53, %v425_v52 }
  0x76   : > { %1091 = vmatpush1.bf16.msra.mxu0 %v1090_v20  ;;  %v491_v59 = vld [vmem:[#allocation5 + $0x358] sm:$0xff]  ;;  %v424_v61 = vld [vmem:[#allocation5 + $0x140] sm:$0xff]  ;;  %v426_v62 = vld [vmem:[#allocation5 + $0x150] sm:$0xff]  ;;  %v1166_v1 = vpack.c.bf16 %v486_v56, %v484_v55  ;;  %v358_v20 = vsub.s32 1, %v1608_v0 }
  0x77   : > { %1093 = vmatprep.subr.bf16.mxu0 %v1092_v23  ;;  %v429_v63 = vld [vmem:[#allocation5 + $0x168] sm:$0xff]  ;;  %v431_v2 = vld [vmem:[#allocation5 + $0x178] sm:$0xff]  ;;  %v488_v3 = vld [vmem:[#allocation5 + $0x340] sm:$0xff]  ;;  %v1168_v5 = vpack.c.bf16 %v491_v59, %v489_v58  ;;  %v1106_v11 = vpack.c.bf16 %v426_v62, %v424_v61 }
  0x78   : > { %1155 = vmatpush1.bf16.msra.mxu1 %v1154_v26  ;;  %v490_v4 = vld [vmem:[#allocation5 + $0x350] sm:$0xff]  ;;  %v1610_v6 = vld [vmem:[#allocation5 + $0x160] sm:$0xff]  ;;  %v1612_v7 = vld [vmem:[#allocation5 + $0x368] sm:$0xff]  ;;  %v1108_v15 = vpack.c.bf16 %v431_v2, %v429_v63 }
  0x79   : > { %1157 = vmatprep.subr.bf16.mxu1 %v1156_v29  ;;  %v495_v8 = vld [vmem:[#allocation5 + $0x378] sm:$0xff]  ;;  %v1616_v12 = vld [vmem:[#allocation5 + $0x170] sm:$0xff]  ;;  %v1618_v13 = vld [vmem:[#allocation5 + $0x188] sm:$0xff]  ;;  %v1170_v22 = vpack.c.bf16 %v490_v4, %v488_v3 }
  0x7a   : > { %1095 = vmatpush1.bf16.msra.mxu0 %v1094_v32  ;;  %v1620_v14 = vld [vmem:[#allocation5 + $0x198] sm:$0xff]  ;;  %v1622_v16 = vld [vmem:[#allocation5 + $0x360] sm:$0xff]  ;;  %v1624_v17 = vld [vmem:[#allocation5 + $0x370] sm:$0xff]  ;;  %v1172_v23 = vpack.c.bf16 %v495_v8, %v1612_v7  ;;  %v1110_v37 = vpack.c.bf16 %v1616_v12, %v1610_v6 }
  0x7b   : > { %1097 = vmatprep.subr.bf16.mxu0 %v1096_v35  ;;  %v314_v18 = vld [vmem:[%s1598_s12 + $0x8] sm:$0xff]  ;;  %v350_v26 = vld [vmem:[%s1942_s5] sm:$0xf]  ;;  %v1640_v29 = vld [vmem:[#allocation5 + $0x190] sm:$0xff]  ;;  %v1174_v53 = vpack.c.bf16 %v1624_v17, %v1622_v16 }
  0x7c   : > { %1159 = vmatpush1.bf16.msra.mxu1 %v1158_v38  ;;  %v996_v19 = vld [vmem:[%s1598_s12 + $0x68] sm:$0xff]  ;;  %v313_v27 = vld [vmem:[%s1598_s12] sm:$0xff]  ;;  %v1642_v30 = vld [vmem:[#allocation5 + $0x398] sm:$0xff]  ;;  %v1646_v31 = vrot.slane %v350_v26, %v358_v20  ;;  %v1651_v33 = vrot.slane %v350_v26, %v354_v21  ;;  %v1654_v35 = vrot.slane %v350_v26, %v366_v9  ;;  %v1656_v36 = vrot.slane %v350_v26, %v362_v10 }
  0x7d   : > { %1161 = vmatprep.subr.bf16.mxu1 %v1160_v41  ;;  %v1631_v24 = vld [vmem:[#allocation5 + $0x388] sm:$0xff]  ;;  %v339_v25 = vsub.f32 %v996_v19, %v314_v18  ;;  %v1638_v28 = vld [vmem:[#allocation5 + $0x180] sm:$0xff]  ;;  %v316_v34 = vld [vmem:[%s1598_s12 + $0x18] sm:$0xff] }
  0x7e   : > { %1099 = vmatpush1.bf16.msra.mxu0 %v1098_v44  ;;  %v995_v32 = vld [vmem:[%s1598_s12 + $0x60] sm:$0xff]  ;;  %v1660_v38 = vld [vmem:[#allocation5 + $0x1a8] sm:$0xff]  ;;  %v1662_v39 = vld [vmem:[#allocation5 + $0x1b8] sm:$0xff]  ;;  %v1112_v44 = vpack.c.bf16 %v1620_v14, %v1618_v13  ;;  %v1114_v3 = vpack.c.bf16 %v1640_v29, %v1638_v28 }
  0x7f   : > { %1101 = vmatprep.subr.bf16.mxu0 %v1100_v47  ;;  %603 = vmatprep.mubr.f32.mxu0 %v339_v25  ;;  %v1664_v40 = vsub.f32 %v995_v32, %v313_v27  ;;  %v998_v41 = vld [vmem:[%s1598_s12 + $0x78] sm:$0xff]  ;;  %v315_v42 = vld [vmem:[%s1598_s12 + $0x10] sm:$0xff]  ;;  %v1671_v45 = vld [vmem:[#allocation5 + $0x380] sm:$0xff]  ;;  %v373_v47 = vmul.f32 %v1646_v31, %v339_v25  ;;  %v1116_v9 = vpack.c.bf16 %v1662_v39, %v1660_v38 }
  0x80   : > { %1163 = vmatpush1.bf16.msra.mxu1 %v1162_v51  ;;  %v997_v43 = vld [vmem:[%s1598_s12 + $0x70] sm:$0xff]  ;;  %v341_v48 = vsub.f32 %v998_v41, %v316_v34  ;;  %v318_v50 = vld [vmem:[%s1598_s12 + $0x28] sm:$0xff]  ;;  %v317_v52 = vld [vmem:[%s1598_s12 + $0x20] sm:$0xff] }
  0x81   : > { %1165 = vmatprep.subr.bf16.mxu1 %v1164_v54  ;;  %v1673_v46 = vld [vmem:[#allocation5 + $0x390] sm:$0xff]  ;;  %v1676_v49 = vsub.f32 %v997_v43, %v315_v42  ;;  %v1000_v51 = vld [vmem:[%s1598_s12 + $0x88] sm:$0xff]  ;;  %v1176_v54 = vpack.c.bf16 %v1642_v30, %v1631_v24  ;;  %v503_v56 = vld [vmem:[#allocation5 + $0x3b8] sm:$0xff]  ;;  %876 = vst [vmem:[%s1694_s17 + $0x8] sm:$0xff] %v373_v47 }
  0x82   : > { %1103 = vmatpush1.bf16.msra.mxu0 %v1102_v57  ;;  %v1685_v55 = vld [vmem:[#allocation5 + $0x3a8] sm:$0xff]  ;;  %v372_v57 = vmul.f32 %v1651_v33, %v1664_v40  ;;  %v1689_v58 = vsub.f32 %v1000_v51, %v318_v50  ;;  %v999_v59 = vld [vmem:[%s1598_s12 + $0x80] sm:$0xff]  ;;  %1009 = vmatprep.mubr.msk.f32.mxu1 %vm522_vm0, %v341_v48  ;;  %v319_v63 = vld [vmem:[%s1598_s12 + $0x30] sm:$0xff]  ;;  %v1178_v16 = vpack.c.bf16 %v1673_v46, %v1671_v45 }
  0x83   : > { %1105 = vmatprep.subr.bf16.mxu0 %v1104_v60  ;;  %v1698_v60 = vmul.f32 %v1654_v35, %v341_v48  ;;  %v374_v61 = vmul.f32 %v1656_v36, %v1676_v49  ;;  %v1703_v62 = vsub.f32 %v999_v59, %v317_v52  ;;  %v322_v2 = vld [vmem:[%s1598_s12 + $0x48] sm:$0xff]  ;;  %v321_v7 = vld [vmem:[%s1598_s12 + $0x40] sm:$0xff]  ;;  %v443_v18 = vld [vmem:[#allocation5 + $0x1d8] sm:$0xff] }
  0x84   : > { %1167 = vmatpush1.bf16.msra.mxu1 %v1166_v1  ;;  %v1001_v1 = vld [vmem:[%s1598_s12 + $0x90] sm:$0xff]  ;;  %875 = vst [vmem:[%s1694_s17] sm:$0xff] %v372_v57  ;;  %v377_v4 = vmul.f32 %v1646_v31, %v1689_v58  ;;  %v1004_v6 = vld [vmem:[%s1598_s12 + $0xa8] sm:$0xff]  ;;  %v1003_v8 = vld [vmem:[%s1598_s12 + $0xa0] sm:$0xff] }
  0x85   : > { %1169 = vmatprep.subr.bf16.mxu1 %v1168_v5  ;;  %v1713_v5 = vsub.f32 %v1001_v1, %v319_v63  ;;  %v436_v10 = vld [vmem:[#allocation5 + $0x1a0] sm:$0xff]  ;;  %877 = vst [vmem:[%s1694_s17 + $0x10] sm:$0xff] %v374_v61  ;;  %v376_v12 = vmul.f32 %v1651_v33, %v1703_v62  ;;  %v1723_v13 = vsub.f32 %v1004_v6, %v322_v2  ;;  %v441_v17 = vld [vmem:[#allocation5 + $0x1c8] sm:$0xff]  ;;  %v502_v25 = vld [vmem:[#allocation5 + $0x3b0] sm:$0xff] }
  0x86   : > { %1107 = vmatpush1.bf16.msra.mxu0 %v1106_v11  ;;  %v438_v11 = vld [vmem:[#allocation5 + $0x1b0] sm:$0xff]  ;;  %v1725_v14 = vsub.f32 %v1003_v8, %v321_v7  ;;  %880 = vst [vmem:[%s1694_s17 + $0x28] sm:$0xff] %v377_v4  ;;  %v500_v24 = vld [vmem:[#allocation5 + $0x3a0] sm:$0xff]  ;;  %v505_v30 = vld [vmem:[#allocation5 + $0x3c8] sm:$0xff]  ;;  %v1120_v34 = vpack.c.bf16 %v443_v18, %v441_v17 }
  0x87   : > { %1109 = vmatprep.subr.bf16.mxu0 %v1108_v15  ;;  %v323_v15 = vld [vmem:[%s1598_s12 + $0x50] sm:$0xff]  ;;  %v378_v19 = vmul.f32 %v1656_v36, %v1713_v5  ;;  %879 = vst [vmem:[%s1694_s17 + $0x20] sm:$0xff] %v376_v12  ;;  %v381_v26 = vmul.f32 %v1646_v31, %v1723_v13  ;;  %v1118_v29 = vpack.c.bf16 %v438_v11, %v436_v10  ;;  %v507_v32 = vld [vmem:[#allocation5 + $0x3d8] sm:$0xff]  ;;  %v504_v43 = vld [vmem:[#allocation5 + $0x3c0] sm:$0xff] }
  0x88   : > { %1171 = vmatpush1.bf16.msra.mxu1 %v1170_v22  ;;  %v1005_v22 = vld [vmem:[%s1598_s12 + $0xb0] sm:$0xff]  ;;  %v380_v27 = vmul.f32 %v1651_v33, %v1725_v14  ;;  %v1182_v39 = vpack.c.bf16 %v502_v25, %v500_v24  ;;  %v445_v33 = vld [vmem:[#allocation5 + $0x1e8] sm:$0xff]  ;;  %v447_v41 = vld [vmem:[#allocation5 + $0x1f8] sm:$0xff]  ;;  %v1184_v42 = vpack.c.bf16 %v507_v32, %v505_v30 }
  0x89   : > { %1173 = vmatprep.subr.bf16.mxu1 %v1172_v23  ;;  %v1180_v23 = vpack.c.bf16 %v503_v56, %v1685_v55  ;;  %v1740_v28 = vsub.f32 %v1005_v22, %v323_v15  ;;  %881 = vst [vmem:[%s1694_s17 + $0x30] sm:$0xff] %v378_v19  ;;  %v442_v38 = vld [vmem:[#allocation5 + $0x1d0] sm:$0xff]  ;;  %884 = vst [vmem:[%s1694_s17 + $0x48] sm:$0xff] %v381_v26  ;;  %v1124_v46 = vpack.c.bf16 %v447_v41, %v445_v33  ;;  %v444_v47 = vld [vmem:[#allocation5 + $0x1e0] sm:$0xff] }
  0x8a   : > { %1111 = vmatpush1.bf16.msra.mxu0 %v1110_v37  ;;  %v440_v37 = vld [vmem:[#allocation5 + $0x1c0] sm:$0xff]  ;;  %883 = vst [vmem:[%s1694_s17 + $0x40] sm:$0xff] %v380_v27  ;;  %v446_v48 = vld [vmem:[#allocation5 + $0x1f0] sm:$0xff]  ;;  %v728_v51 = vld [vmem:[%s1940_s3 + $0x88] sm:$0xff] }
  0x8b   : > { %1113 = vmatprep.subr.bf16.mxu0 %v1112_v44  ;;  %v382_v31 = vmul.f32 %v1656_v36, %v1740_v28  ;;  %v506_v44 = vld [vmem:[#allocation5 + $0x3d0] sm:$0xff]  ;;  %v1122_v45 = vpack.c.bf16 %v442_v38, %v440_v37  ;;  %v727_v36 = vld [vmem:[%s1940_s3 + $0x80] sm:$0xff]  ;;  %v1126_v52 = vpack.c.bf16 %v446_v48, %v444_v47  ;;  %v1002_v55 = vld [vmem:[%s1598_s12 + $0x98] sm:$0xff] }
  0x8c   : > { %1175 = vmatpush1.bf16.msra.mxu1 %v1174_v53  ;;  %v1186_v50 = vpack.c.bf16 %v506_v44, %v504_v43  ;;  %v509_v53 = vld [vmem:[#allocation5 + $0x3e8] sm:$0xf]  ;;  %v1188_v56 = vpack.c.bf16 %v728_v51, %v727_v36  ;;  %v711_v57 = vld [vmem:[%s1940_s3] sm:$0xff]  ;;  %v729_v63 = vld [vmem:[%s1940_s3 + $0x90] sm:$0xff] }
  0x8d   : > { %1177 = vmatprep.subr.bf16.mxu1 %v1176_v54  ;;  %885 = vst [vmem:[%s1694_s17 + $0x50] sm:$0xff] %v382_v31  ;;  %v320_v54 = vld [vmem:[%s1598_s12 + $0x38] sm:$0xff]  ;;  %v712_v59 = vld [vmem:[%s1940_s3 + $0x8] sm:$0xff]  ;;  %v508_v61 = vld [vmem:[#allocation5 + $0x3e0] sm:$0xf] }
  0x8e   : > { %1115 = vmatpush1.bf16.msra.mxu0 %v1114_v3  ;;  %v730_v1 = vld [vmem:[%s1940_s3 + $0x98] sm:$0xff]  ;;  %v1769_v2 = vsub.f32 %v1002_v55, %v320_v54  ;;  %v1190_v6 = vpack.c.bf16 %v712_v59, %v711_v57  ;;  %v713_v8 = vld [vmem:[%s1940_s3 + $0x10] sm:$0xff]  ;;  %v731_v10 = vld [vmem:[%s1940_s3 + $0xa0] sm:$0xff] }
  0x8f   : > { %1117 = vmatprep.subr.bf16.mxu0 %v1116_v9  ;;  %v324_v3 = vld [vmem:[%s1598_s12 + $0x58] sm:$0xff]  ;;  %v1192_v7 = vpack.c.bf16 %v730_v1, %v729_v63  ;;  %v732_v11 = vld [vmem:[%s1940_s3 + $0xa8] sm:$0xff]  ;;  %v715_v15 = vld [vmem:[%s1940_s3 + $0x20] sm:$0xff] }
  0x90   : > { %1179 = vmatpush1.bf16.msra.mxu1 %v1178_v16  ;;  %v1006_v4 = vld [vmem:[%s1598_s12 + $0xb8] sm:$0xff]  ;;  %v716_v16 = vld [vmem:[%s1940_s3 + $0x28] sm:$0xff]  ;;  %v737_v26 = vld [vmem:[%s1940_s3 + $0xd0] sm:$0xff] }
  0x91   : > { %1181 = vmatprep.subr.bf16.mxu1 %v1180_v23  ;;  %v714_v9 = vld [vmem:[%s1940_s3 + $0x18] sm:$0xff]  ;;  %v1791_v12 = vsub.f32 %v1006_v4, %v324_v3  ;;  %v1198_v18 = vpack.c.bf16 %v716_v16, %v715_v15  ;;  %v736_v22 = vld [vmem:[%s1940_s3 + $0xc8] sm:$0xff]  ;;  %v721_v30 = vld [vmem:[%s1940_s3 + $0x50] sm:$0xff] }
  0x92   : > { %1119 = vmatpush1.bf16.msra.mxu0 %v1118_v29  ;;  %v734_v17 = vld [vmem:[%s1940_s3 + $0xb8] sm:$0xff]  ;;  %v720_v25 = vld [vmem:[%s1940_s3 + $0x48] sm:$0xff]  ;;  %v739_v37 = vld [vmem:[%s1940_s3 + $0xe0] sm:$0xff] }
  0x93   : > { %1121 = vmatprep.subr.bf16.mxu0 %v1120_v34  ;;  %v718_v19 = vld [vmem:[%s1940_s3 + $0x38] sm:$0xff]  ;;  %v740_v38 = vld [vmem:[%s1940_s3 + $0xe8] sm:$0xff]  ;;  %v510_v48 = vld [vmem:[%s1939_s2] sm:$0x3] }
  0x94   : > { %1183 = vmatpush1.bf16.msra.mxu1 %v1182_v39  ;;  %v738_v27 = vld [vmem:[%s1940_s3 + $0xd8] sm:$0xff]  ;;  %v1212_v31 = vpack.c.bf16 %v740_v38, %v739_v37  ;;  %v723_v39 = vld [vmem:[%s1940_s3 + $0x60] sm:$0xff]  ;;  %v724_v33 = vld [vmem:[%s1940_s3 + $0x68] sm:$0xff]  ;;  %v519_v36 = vrot.slane %v510_v48, %v358_v20 }
  0x95   : > { %1185 = vmatprep.subr.bf16.mxu1 %v1184_v42  ;;  %v1208_v29 = vpack.c.bf16 %v738_v27, %v737_v26  ;;  %v722_v32 = vld [vmem:[%s1940_s3 + $0x58] sm:$0xff]  ;;  %v1214_v41 = vpack.c.bf16 %v724_v33, %v723_v39  ;;  %v741_v42 = vld [vmem:[%s1940_s3 + $0xf0] sm:$0xff] }
  0x96   : > { %1123 = vmatpush1.bf16.msra.mxu0 %v1122_v45  ;;  %v1210_v34 = vpack.c.bf16 %v722_v32, %v721_v30  ;;  %v742_v43 = vld [vmem:[%s1940_s3 + $0xf8] sm:$0xff]  ;;  %v725_v45 = vld [vmem:[%s1940_s3 + $0x70] sm:$0xff] }
  0x97   : > { %1125 = vmatprep.subr.bf16.mxu0 %v1124_v46  ;;  %v1216_v44 = vpack.c.bf16 %v742_v43, %v741_v42  ;;  %v726_v46 = vld [vmem:[%s1940_s3 + $0x78] sm:$0xff] }
  0x98   : > { %1187 = vmatpush1.bf16.msra.mxu1 %v1186_v50  ;;  %v1218_v47 = vpack.c.bf16 %v726_v46, %v725_v45  ;;  %v515_v50 = vrot.slane %v510_v48, %v354_v21 }
  0x99   : > { %1007 = vmatprep.subr.msk.mxu1 %vm532_vm1, %v509_v53 }
  0x9a   : > { %1127 = vmatpush1.bf16.msra.mxu0 %v1126_v52 }
  0x9b   : > { %1189 = vmatprep.subr.bf16.mxu0 %v1188_v56 }
  0x9c   : > { %1008 = vmatpush1.msk.msra.mxu1 %vm532_vm1, %v508_v61 }
  0x9d   : > { %604 = vmatmul.mubr.f32.vlgmr.msra.gmra.mrb[0].mxu0 %v1664_v40  ;;  %687 = vmatmul.mubr.f32.vlgmr.msra.gmra.mrb[0].mxu1 %v1676_v49  ;;  %v1194_v40 = vpack.c.bf16 %v714_v9, %v713_v8  ;;  %v1196_v49 = vpack.c.bf16 %v732_v11, %v731_v10 }
  0x9e   : > { %609 = vmatprep.mubr.f32.mxu0 %v1689_v58  ;;  %1010 = vmatprep.mubr.msk.f32.mxu1 %vm522_vm0, %v1769_v2  ;;  %v733_v58 = vld [vmem:[%s1940_s3 + $0xb0] sm:$0xff] }
  0x9f   : > { %1191 = vmatpush3.bf16.msra.mxu0 %v1190_v6  ;;  %1220 = vmatprep.subr.bf16.mxu1 %v1188_v56 }
  0xa0   : > { %1193 = vmatprep.subr.bf16.mxu0 %v1192_v7  ;;  %1228 = vmatpush3.bf16.msra.mxu1 %v1190_v6 }
  0xa1   : > { %610 = vmatmul.mubr.f32.gmra.mrb[2].mxu0 %v1703_v62  ;;  %693 = vmatmul.mubr.f32.gmra.mrb[2].mxu1 %v1713_v5  ;;  %v1200_v62 = vpack.c.bf16 %v734_v17, %v733_v58  ;;  %v717_v5 = vld [vmem:[%s1940_s3 + $0x30] sm:$0xff] }
  0xa2   : > { %615 = vmatprep.mubr.f32.mxu0 %v1723_v13  ;;  %1011 = vmatprep.mubr.msk.f32.mxu1 %vm522_vm0, %v1791_v12  ;;  %v735_v13 = vld [vmem:[%s1940_s3 + $0xc0] sm:$0xff]  ;;  %v1202_v23 = vpack.c.bf16 %v718_v19, %v717_v5 }
  0xa3   : > { %1195 = vmatpush3.bf16.msra.mxu0 %v1194_v40  ;;  %1221 = vmatprep.subr.bf16.mxu1 %v1192_v7  ;;  %v1204_v24 = vpack.c.bf16 %v736_v22, %v735_v13  ;;  %v1012_v19 = vld [vmem:[%s1941_s4] ss:$0 sm:$0xff] }
  0xa4   : > { %1197 = vmatprep.subr.bf16.mxu0 %v1196_v49  ;;  %1229 = vmatpush3.bf16.msra.mxu1 %v1194_v40 }
  0xa5   : > { %616 = vmatmul.mubr.f32.gmra.mrb[4].mxu0 %v1725_v14  ;;  %699 = vmatmul.mubr.f32.gmra.mrb[4].mxu1 %v1740_v28  ;;  %v719_v14 = vld [vmem:[%s1940_s3 + $0x40] sm:$0xff] }
  0xa6   : > { %1222 = vmatprep.subr.bf16.mxu1 %v1196_v49  ;;  %v1206_v28 = vpack.c.bf16 %v720_v25, %v719_v14 }
  0xa7   : > { %1199 = vmatpush3.bf16.msra.mxu0 %v1198_v18 }
  0xa8   : > { %1201 = vmatprep.subr.bf16.mxu0 %v1200_v62  ;;  %1230 = vmatpush3.bf16.msra.mxu1 %v1198_v18 }
  0xa9   : > { %1223 = vmatprep.subr.bf16.mxu1 %v1200_v62 }
  0xab   : > { %1203 = vmatpush3.bf16.msra.mxu0 %v1202_v23 }
  0xac   : > { %1205 = vmatprep.subr.bf16.mxu0 %v1204_v24  ;;  %1231 = vmatpush3.bf16.msra.mxu1 %v1202_v23 }
  0xad   : > { %1224 = vmatprep.subr.bf16.mxu1 %v1204_v24 }
  0xaf   : > { %1207 = vmatpush3.bf16.msra.mxu0 %v1206_v28 }
  0xb0   : > { %1209 = vmatprep.subr.bf16.mxu0 %v1208_v29  ;;  %1232 = vmatpush3.bf16.msra.mxu1 %v1206_v28 }
  0xb1   : > { %1225 = vmatprep.subr.bf16.mxu1 %v1208_v29 }
  0xb3   : > { %1211 = vmatpush3.bf16.msra.mxu0 %v1210_v34 }
  0xb4   : > { %1233 = vmatpush3.bf16.msra.mxu1 %v1210_v34  ;;  %1213 = vmatprep.subr.bf16.mxu0 %v1212_v31 }
  0xb5   : > { %1226 = vmatprep.subr.bf16.mxu1 %v1212_v31 }
  0xb7   : > { %1215 = vmatpush3.bf16.msra.mxu0 %v1214_v41 }
  0xb8   : > { %1234 = vmatpush3.bf16.msra.mxu1 %v1214_v41  ;;  %1217 = vmatprep.subr.bf16.mxu0 %v1216_v44 }
  0xb9   : > { %1227 = vmatprep.subr.bf16.mxu1 %v1216_v44 }
  0xbb   : > { %1219 = vmatpush3.bf16.msra.mxu0 %v1218_v47 }
  0xbc   : > { %1235 = vmatpush3.bf16.msra.mxu1 %v1218_v47 }
 0x170   : > { %v605_v51 = vpop.f32.mrb[0].mxu0  ;;  %v688_v52 = vpop.f32.mrb[0].mxu1 }
 0x171   : > { %v606_v53 = vadd.f32 %v605_v51, %v515_v50  ;;  %v607_v54 = vpop.f32.mrb[1].mxu0  ;;  %v690_v55 = vpop.f32.mrb[1].mxu1 }
 0x172   : > { %v608_v56 = vadd.f32 %v607_v54, %v519_v36 }
 0x173   : > { %v689_v57 = vadd.f32 %v688_v52, %v606_v53 }
 0x174   : > { %v691_v59 = vadd.f32 %v690_v55, %v608_v56  ;;  %v611_v61 = vpop.f32.mrb[2].mxu0  ;;  %v694_v63 = vpop.f32.mrb[2].mxu1 }
 0x175   : > { %v612_v1 = vadd.f32 %v611_v61, %v515_v50  ;;  %v613_v3 = vpop.f32.mrb[3].mxu0  ;;  %v696_v4 = vpop.f32.mrb[3].mxu1  ;;  %v705_v8 = vmax.f32 %v689_v57, 0.0 }
 0x176   : > { %v706_v6 = vmax.f32 %v691_v59, 0.0  ;;  %v614_v7 = vadd.f32 %v613_v3, %v519_v36 }
 0x177   : > { %v695_v21 = vadd.f32 %v694_v63, %v612_v1 }
 0x178   : > { %v697_v9 = vadd.f32 %v696_v4, %v614_v7  ;;  %v617_v0 = vpop.f32.mrb[4].mxu0  ;;  %814 = vmatprep.mubr.f32.mxu0 %v706_v6  ;;  %v700_v20 = vpop.f32.mrb[4].mxu1 }
 0x179   : > { %v618_v10 = vadd.f32 %v617_v0, %v515_v50  ;;  %v619_v11 = vpop.f32.mrb[5].mxu0  ;;  %815 = vmatmul.mubr.f32.vlgmr.msra.gmra.mrb[6].mxu0 %v705_v8  ;;  %v702_v40 = vpop.f32.mrb[5].mxu1  ;;  %v707_v16 = vmax.f32 %v695_v21, 0.0  ;;  %v379_v8 = vmul.f32 %v1654_v35, %v1769_v2  ;;  %v383_v0 = vmul.f32 %v1654_v35, %v1791_v12 }
 0x17a   : > { %v708_v49 = vmax.f32 %v697_v9, 0.0  ;;  %v620_v15 = vadd.f32 %v619_v11, %v519_v36 }
 0x17b   : > { %v701_v58 = vadd.f32 %v700_v20, %v618_v10 }
 0x17c   : > { %v703_v17 = vadd.f32 %v702_v40, %v620_v15  ;;  %819 = vmatprep.mubr.f32.mxu1 %v708_v49 }
 0x17d   : > { %820 = vmatmul.mubr.f32.vlgmr.msra.gmra.mrb[6].mxu1 %v707_v16  ;;  %v709_v62 = vmax.f32 %v701_v58, 0.0 }
 0x17e   : > { %v710_v18 = vmax.f32 %v703_v17, 0.0 }
 0x180   : > { %824 = vmatprep.mubr.f32.mxu1 %v710_v18 }
 0x181   : > { %825 = vmatmul.mubr.f32.gmra.mrb[8].mxu1 %v709_v62 }
 0x24c   : > { %v1055_v5 = vpop.f32.mrb[6].mxu0 }
 0x24d   : > { %v1056_v13 = vpop.f32.mrb[7].mxu0 }
 0x24e   : > { %v1057_v22 = vadd.f32 %v1056_v13, %v1055_v5 }
 0x250   : > { %v817_v23 = vadd.f32 %v1057_v22, %v1012_v19  ;;  %v1058_v24 = vpop.f32.mrb[6].mxu1 }
 0x251   : > { %v1059_v14 = vpop.f32.mrb[7].mxu1 }
 0x252   : > { %v833_v25 = vand.u32 2147483647, %v817_v23  ;;  %v1060_v26 = vadd.f32 %v1059_v14, %v1058_v24  ;;  %v830_v36 = vmax.f32 %v817_v23, 0.0 }
 0x254   : > { %v836_v27 = vsub.f32 0.0, %v833_v25  ;;  %v822_v28 = vadd.f32 %v1060_v26, %v1012_v19  ;;  %v1061_v29 = vpop.f32.mrb[8].mxu1 }
 0x255   : > { %v1062_v30 = vpop.f32.mrb[9].mxu1 }
 0x256   : > { %v839_v32 = vmul.f32 1.442695, %v836_v27  ;;  %v834_v34 = vand.u32 2147483647, %v822_v28  ;;  %v1063_v37 = vadd.f32 %v1062_v30, %v1061_v29  ;;  %v831_v54 = vmax.f32 %v822_v28, 0.0 }
 0x258   : > { %1321 = vpow2.f32 %v839_v32  ;;  %v837_v38 = vsub.f32 0.0, %v834_v34  ;;  %v827_v31 = vadd.f32 %v1063_v37, %v1012_v19 }
 0x25a   : > { %v841_v39 = vmul.f32 1.442695, %v837_v38  ;;  %v835_v33 = vand.u32 2147483647, %v827_v31  ;;  %v832_v63 = vmax.f32 %v827_v31, 0.0 }
 0x25c   : > { %1323 = vpow2.f32 %v841_v39  ;;  %v838_v41 = vsub.f32 0.0, %v835_v33 }
 0x25e   : > { %v843_v42 = vmul.f32 1.442695, %v838_v41 }
 0x260   : > { %1325 = vpow2.f32 %v843_v42 }
 0x262   : > { %v1322_v43 = vpop.eup %1321 }
 0x263   : > { %v845_v44 = vadd.f32 1.0, %v1322_v43 }
 0x265   : > { %1327 = vlog2.f32 %v845_v44 }
 0x266   : > { %v1324_v45 = vpop.eup %1323 }
 0x267   : > { %v846_v46 = vadd.f32 1.0, %v1324_v45 }
 0x269   : > { %1329 = vlog2.f32 %v846_v46 }
 0x26a   : > { %v1326_v47 = vpop.eup %1325 }
 0x26b   : > { %v847_v48 = vadd.f32 1.0, %v1326_v47 }
 0x26d   : > { %1331 = vlog2.f32 %v847_v48 }
 0x26f   : > { %v1328_v50 = vpop.eup %1327 }
 0x270   : > { %v849_v51 = vmul.f32 0.6931472, %v1328_v50 }
 0x272   : > { %v854_v52 = vadd.f32 %v849_v51, %v830_v36 }
 0x273   : > { %v1330_v53 = vpop.eup %1329 }
 0x274   : > { %v857_v55 = vsub.f32 0.0, %v854_v52  ;;  %v851_v56 = vmul.f32 0.6931472, %v1330_v53 }
 0x276   : > { %863 = vrot.lane.b32.xlu0 %v857_v55, %s1442_s14  ;;  %v855_v57 = vadd.f32 %v851_v56, %v831_v54 }
 0x277   : > { %v1332_v59 = vpop.eup %1331 }
 0x278   : > { %v858_v61 = vsub.f32 0.0, %v855_v57  ;;  %v853_v1 = vmul.f32 0.6931472, %v1332_v59 }
 0x27a   : > { %865 = vrot.lane.b32.xlu0 %v858_v61, %s1442_s14  ;;  %v856_v3 = vadd.f32 %v853_v1, %v832_v63 }
 0x27c   : > { %v859_v4 = vsub.f32 0.0, %v856_v3 }
 0x27e   : > { %867 = vrot.lane.b32.xlu1 %v859_v4, %s1442_s14 }
 0x2e8   : > { %v864_v6 = vpop.permute.xlu0 %863 }
 0x2e9   : > { %v872_v7 = vsel %vm522_vm0, %v1698_v60, %v864_v6 }
 0x2ea   : > { %878 = vst [vmem:[%s1694_s17 + $0x18] sm:$0xff] %v872_v7 }
 0x2ec   : > { %v866_v21 = vpop.permute.xlu0 %865 }
 0x2ed   : > { %v873_v9 = vsel %vm522_vm0, %v379_v8, %v866_v21 }
 0x2ee   : > { %882 = vst [vmem:[%s1694_s17 + $0x38] sm:$0xff] %v873_v9 }
 0x2f0   : > { %v868_v60 = vpop.permute.xlu1 %867 }
 0x2f1   : > { %v874_v2 = vsel %vm522_vm0, %v383_v0, %v868_v60 }
 0x2f2   : > { %886 = vst [vmem:[%s1694_s17 + $0x58] sm:$0xff] %v874_v2 }
 0x2f3   : > { %1374 = shalt.err (!%p1371_p1)
}
 0x2f4   : > { %s1375_s17 = scalar_lea.hbm %s1890_s11, 1536  ;;  %s1379_s18 = scalar_lea.hbm %s1943_s6, 4608 }
 0x2f5   : > { %p1376_p0 = scmp.ne.s32.totalorder %s1890_s11, %s1375_s17  ;;  %p1380_p6 = scmp.lt.u32.totalorder %s1890_s11, %s1943_s6 }
 0x2f6   : > { %p1381_p11 = scmp.lt.u32.totalorder %s1379_s18, %s1375_s17  ;;  %p1383_p13 = scmp.lt.u32.totalorder %s1375_s17, %s1890_s11 }
 0x2f7   : > { %p1377_p4 = pnand %p1376_p0, %p1963_p2 }
 0x2f8   : > { %p1382_p12 = por %p1381_p11, %p1380_p6 }
 0x2f9   : > { %p1378_p5 = pneg %p1377_p4 }
 0x2fa   : > { %p1384_p3 = por %p1383_p13, %p1382_p12 }
 0x2fc   : > { %p1385_p7 = pnand %p1384_p3, %p1378_p5 }
 0x2fe   : > { %1388 = shalt.err (!%p1385_p7)
}
 0x2ff   : > { %s1444_s14 = smov 512   ;;  %s1445_s30 = smov 32  }
 0x300   : > { %1264 = dma.vmem_to_hbm [thread:$0]  (%p1963_p2), %s1892_s26, 1536, %s1890_s11, %s888_s25, %s1444_s14, %s1444_s14, %s1445_s30  }
 0x301 PF: > { %p1276_p8 = scmp.ge.s32.totalorder %s1431_s24, 2  ;;  %s917_s7 = sand.u32 1, %s1419_s21  }
 0x302   : > { %p1964_p9 = scmp.ne.s32.totalorder %s1954_s10, 0  ;;  %s918_s8 = scalar_lea.sflag [#allocation4], %s917_s7 }
 0x304   : > { %p1271_p10 = pnand %p1276_p8, %p1964_p9 }
 0x306   : > { %1414 = dma.done.wait (!%p1271_p10), %s918_s8, 1536  }
 0x307   : > { %1416 = vsyncadd (!%p1271_p10), %s918_s8, 4294965760  ;;  %s1965_s28 = sld [smem:[#allocation14_spill]]  ;;  %p20_p1 = scmp.ge.s32.totalorder %s1506_s27, 5  }
 0x308   : > { %s1966_s21 = smov %s1423_s22  ;;  %s1967_s22 = smov %s1427_s23 }
 0x309   : > { %s1969_s24 = smov %s1506_s27  ;;  %22 = sbr.rel (!%p20_p1) target bundleno = 8 (0x8), region = 99 }
 0x30d   : > { %s1968_s23 = smov %s1965_s28 }
 0x310   :  { %923 = vsyncpa [#allocation3], 1 }
 0x311   :  { %925 = vsyncpa [#allocation3 + $0x1], 1 }
 0x312   :  { %926 = vsyncpa [#allocation6], 1 }
 0x313   :  { %927 = vsyncpa [#allocation4], 1 }
 0x314   :  { %929 = vsyncpa [#allocation4 + $0x1], 1 }

</bundles_post_ra>
